<compile_context>
chip_gen: v7x
topology: tpu7x:2x2x1
jax: 0.10.0
libtpu: 0.0.40
codegen_flags: <defaults>
</compile_context>

<pallas_src>
import jax
import jax.numpy as jnp
import numpy as np
from jax.experimental import pallas as pl
from jax.experimental.pallas import tpu as pltpu


def _round_up(x: int, m: int) -> int:
    return (x + m - 1) // m * m


def _cond_kernel(units_ref, f0_ref, vol_ref, spkb_ref,
                 wu_ref, wf_ref, wv_ref, o_ref):
    # Per-grid-step view (leading batch dim squeezed by BlockSpec):
    #   units_ref : (tT, Cp)  f32   (cast to bf16 in-register below)
    #   f0_ref    : (tT, 1)   f32
    #   vol_ref   : (tT, 1)   f32
    #   spkb_ref  : (1,  Hp)  f32   (spk_vec + b_unit + b_f0 + b_vol, pre-folded)
    #   wu_ref    : (Cp, Hp)  bf16
    #   wf_ref    : (1,  Hp)  f32   (Linear(1,H) weight row of f0_embed)
    #   wv_ref    : (1,  Hp)  f32   (Linear(1,H) weight row of volume_embed)
    #   o_ref     : (tT, Hp)  out_dtype

    # unit_embed: bf16 x bf16 on the MXU, f32 accumulate.  The f32->bf16 cast of
    # the streamed units happens here (free VPU filler; avoids a wrapper copy).
    u = units_ref[...].astype(jnp.bfloat16)
    x = jnp.dot(u, wu_ref[...], preferred_element_type=jnp.float32)

    # f0_embed(log(1 + f0/700)): Linear(1,H) == broadcasted outer product.
    f0_feat = jnp.log(1.0 + f0_ref[...] * (1.0 / 700.0))   # (tT, 1), log -> EUP
    x = x + f0_feat * wf_ref[...]                           # (tT,1)*(1,Hp)

    # volume_embed(volume): Linear(1,H)
    x = x + vol_ref[...] * wv_ref[...]

    # speaker embedding + all three biases, broadcast over frames.
    x = x + spkb_ref[...]

    o_ref[...] = x.astype(o_ref.dtype)


def unit2mel_condition(units, f0, volume, spk_vec,
                       w_unit, b_unit, w_f0, b_f0, w_vol, b_vol,
                       *, tile_t=2048, out_dtype=jnp.bfloat16):
    """Conditioning tensor of Unit2Mel.forward.

    units: (B, T, C) f32; f0, volume: (B, T, 1) f32; spk_vec: (B, 1, H) f32
    (already gathered from the embedding table with spk_id - 1).
    Weights are [in, out]; biases are (1, H).
    """
    B, T, C = units.shape
    H = w_unit.shape[1]

    # Lane-dense feature axes; sublane-friendly / tiled frame axis.
    Cp = _round_up(C, 128)
    Hp = _round_up(H, 128)
    if T > tile_t:
        tT = tile_t
        Tp = _round_up(T, tT)
    else:
        Tp = _round_up(T, 16)       # 16: bf16-friendly sublane multiple
        tT = Tp
    nT = Tp // tT

    # Fold the three biases and the speaker vector into one per-batch add
    # (O(B*H) one-time prep, not per-element wrapper pre-scaling).
    spk_bias = spk_vec + b_unit + b_f0 + b_vol           # (B, 1, H)

    pad_t, pad_c, pad_h = Tp - T, Cp - C, Hp - H

    # Only materialise padded copies when actually required; in the aligned
    # common case the f32 inputs stream straight into the kernel.
    units_p = units if (pad_t == 0 and pad_c == 0) else jnp.pad(
        units, ((0, 0), (0, pad_t), (0, pad_c)))
    f0_p = f0 if pad_t == 0 else jnp.pad(f0, ((0, 0), (0, pad_t), (0, 0)))
    vol_p = volume if pad_t == 0 else jnp.pad(volume, ((0, 0), (0, pad_t), (0, 0)))
    spkb_p = spk_bias if pad_h == 0 else jnp.pad(
        spk_bias, ((0, 0), (0, 0), (0, pad_h)))
    wu_p = (w_unit if (pad_c == 0 and pad_h == 0) else jnp.pad(
        w_unit, ((0, pad_c), (0, pad_h)))).astype(jnp.bfloat16)
    wf_p = w_f0 if pad_h == 0 else jnp.pad(w_f0, ((0, 0), (0, pad_h)))
    wv_p = w_vol if pad_h == 0 else jnp.pad(w_vol, ((0, 0), (0, pad_h)))

    const2d = lambda shape: pl.BlockSpec(shape, lambda b, t: (0, 0))

    out = pl.pallas_call(
        _cond_kernel,
        out_shape=jax.ShapeDtypeStruct((B, Tp, Hp), out_dtype),
        grid_spec=pltpu.PrefetchScalarGridSpec(
            num_scalar_prefetch=0,
            grid=(B, nT),
            in_specs=[
                pl.BlockSpec((None, tT, Cp), lambda b, t: (b, t, 0)),  # units f32
                pl.BlockSpec((None, tT, 1),  lambda b, t: (b, t, 0)),  # f0
                pl.BlockSpec((None, tT, 1),  lambda b, t: (b, t, 0)),  # volume
                pl.BlockSpec((None, 1, Hp),  lambda b, t: (b, 0, 0)),  # spk + biases
                const2d((Cp, Hp)),                                     # w_unit bf16
                const2d((1, Hp)),                                      # w_f0
                const2d((1, Hp)),                                      # w_vol
            ],
            out_specs=pl.BlockSpec((None, tT, Hp), lambda b, t: (b, t, 0)),
        ),
        compiler_params=pltpu.CompilerParams(
            dimension_semantics=("parallel", "parallel")),
    )(units_p, f0_p, vol_p, spkb_p, wu_p, wf_p, wv_p)

    # Strip alignment padding only when it was applied (avoids an extra full
    # read+write pass over the output in the aligned case).
    if pad_t or pad_h:
        out = out[:, :T, :H]
    return out


def _reference(units, f0, volume, spk_vec,
               w_unit, b_unit, w_f0, b_f0, w_vol, b_vol):
    # Full-f32 reference (matches the PyTorch math); the kernel's bf16 MXU
    # operands / bf16 output are checked against it with a drift tolerance.
    x = jnp.einsum("btc,ch->bth", units, w_unit,
                   preferred_element_type=jnp.float32) + b_unit
    x = x + jnp.log(1.0 + f0 / 700.0) * w_f0 + b_f0
    x = x + volume * w_vol + b_vol
    x = x + spk_vec
    return x


if __name__ == "__main__":
    # Small shapes consistent with the module's forward:
    #   units: B x n_frames x input_channel ; f0, volume: B x n_frames x 1
    # n_hidden=256 is the module's default; input_channel=256 (typical unit dim).
    B, T = 2, 8
    input_channel = 256     # n_unit
    n_hidden = 256
    n_spk = 4

    key = jax.random.PRNGKey(0)
    keys = jax.random.split(key, 12)

    units  = jax.random.normal(keys[0], (B, T, input_channel), jnp.float32)
    f0     = jax.random.uniform(keys[1], (B, T, 1), jnp.float32,
                                minval=80.0, maxval=400.0)
    volume = jax.random.uniform(keys[2], (B, T, 1), jnp.float32,
                                minval=0.0, maxval=1.0)
    # PyTorch spk_id is 1-based; the module does spk_embed(spk_id - 1).
    spk_id = jax.random.randint(keys[3], (B, 1), 1, n_spk + 1, jnp.int32)

    # Parameter shapes from __init__:
    #   unit_embed:   Linear(input_channel, n_hidden)
    #   f0_embed:     Linear(1, n_hidden)
    #   volume_embed: Linear(1, n_hidden)
    #   spk_embed:    Embedding(n_spk, n_hidden)
    s = 0.05
    w_unit = s * jax.random.normal(keys[4], (input_channel, n_hidden), jnp.float32)
    b_unit = s * jax.random.normal(keys[5], (1, n_hidden), jnp.float32)
    w_f0   = s * jax.random.normal(keys[6], (1, n_hidden), jnp.float32)
    b_f0   = s * jax.random.normal(keys[7], (1, n_hidden), jnp.float32)
    w_vol  = s * jax.random.normal(keys[8], (1, n_hidden), jnp.float32)
    b_vol  = s * jax.random.normal(keys[9], (1, n_hidden), jnp.float32)
    spk_table = s * jax.random.normal(keys[10], (n_spk, n_hidden), jnp.float32)

    # Embedding gather is glue (plain JAX); result is (B, 1, H), broadcast in-kernel.
    spk_vec = spk_table[spk_id - 1]            # (B, 1, H)

    out = unit2mel_condition(units, f0, volume, spk_vec,
                             w_unit, b_unit, w_f0, b_f0, w_vol, b_vol)
    out = jax.block_until_ready(out)

    ref = _reference(units, f0, volume, spk_vec,
                     w_unit, b_unit, w_f0, b_f0, w_vol, b_vol)
    np.testing.assert_allclose(np.asarray(out.astype(jnp.float32)),
                               np.asarray(ref), rtol=5e-2, atol=5e-2)
    print("KERNEL_OK")
</pallas_src>

<mosaic_0001>
module attributes {stable_mosaic.version = 11 : i64} {
  func.func @_cond_kernel(%arg0: i32, %arg1: i32, %arg2: memref<1x16x256xf32, #tpu.memory_space<vmem>>, %arg3: memref<1x16x1xf32, #tpu.memory_space<vmem>>, %arg4: memref<1x16x1xf32, #tpu.memory_space<vmem>>, %arg5: memref<1x1x256xf32, #tpu.memory_space<vmem>>, %arg6: memref<256x256xbf16, #tpu.memory_space<vmem>>, %arg7: memref<1x256xf32, #tpu.memory_space<vmem>>, %arg8: memref<1x256xf32, #tpu.memory_space<vmem>>, %arg9: memref<1x16x256xbf16, #tpu.memory_space<vmem>>) attributes {dimension_semantics = [#tpu.dimension_semantics<parallel>, #tpu.dimension_semantics<parallel>], iteration_bounds = array<i64: 2, 1>, scalar_prefetch = 0 : i64, scratch_operands = 0 : i64, tpu.core_type = #tpu.core_type<tc>, window_params = [{transform_indices = @transform_0, window_bounds = array<i64: 1, 16, 256>}, {transform_indices = @transform_1, window_bounds = array<i64: 1, 16, 1>}, {transform_indices = @transform_2, window_bounds = array<i64: 1, 16, 1>}, {transform_indices = @transform_3, window_bounds = array<i64: 1, 1, 256>}, {pipeline_mode = #tpu.pipeline_mode<synchronous>, transform_indices = @transform_4, window_bounds = array<i64: 256, 256>}, {pipeline_mode = #tpu.pipeline_mode<synchronous>, transform_indices = @transform_5, window_bounds = array<i64: 1, 256>}, {pipeline_mode = #tpu.pipeline_mode<synchronous>, transform_indices = @transform_6, window_bounds = array<i64: 1, 256>}, {transform_indices = @transform_7, window_bounds = array<i64: 1, 16, 256>}]} {
    %c0 = arith.constant 0 : index
    %c0_0 = arith.constant 0 : index
    %c0_1 = arith.constant 0 : index
    %0 = vector.load %arg2[%c0, %c0_0, %c0_1] : memref<1x16x256xf32, #tpu.memory_space<vmem>>, vector<1x16x256xf32>
    %1 = vector.shape_cast %0 : vector<1x16x256xf32> to vector<16x256xf32>
    %2 = arith.truncf %1 : vector<16x256xf32> to vector<16x256xbf16>
    %c0_2 = arith.constant 0 : index
    %c0_3 = arith.constant 0 : index
    %3 = vector.load %arg6[%c0_2, %c0_3] : memref<256x256xbf16, #tpu.memory_space<vmem>>, vector<256x256xbf16>
    %cst = arith.constant dense<0.000000e+00> : vector<16x256xf32>
    %4 = tpu.matmul %2, %3, %cst {dimension_numbers = #tpu.dot_dimension_numbers<[1], [0], [0], [1], [0, 0, 1, 1], [], []>} : vector<16x256xbf16>, vector<256x256xbf16>, vector<16x256xf32> -> vector<16x256xf32>
    %c0_4 = arith.constant 0 : index
    %c0_5 = arith.constant 0 : index
    %c0_6 = arith.constant 0 : index
    %5 = vector.load %arg3[%c0_4, %c0_5, %c0_6] : memref<1x16x1xf32, #tpu.memory_space<vmem>>, vector<1x16x1xf32>
    %6 = vector.shape_cast %5 : vector<1x16x1xf32> to vector<16x1xf32>
    %cst_7 = arith.constant 0.00142857141 : f32
    %7 = vector.broadcast %cst_7 : f32 to vector<16x1xf32>
    %8 = arith.mulf %6, %7 : vector<16x1xf32>
    %cst_8 = arith.constant 1.000000e+00 : f32
    %9 = vector.broadcast %cst_8 : f32 to vector<16x1xf32>
    %10 = arith.addf %9, %8 : vector<16x1xf32>
    %11 = math.log %10 : vector<16x1xf32>
    %c0_9 = arith.constant 0 : index
    %c0_10 = arith.constant 0 : index
    %12 = vector.load %arg7[%c0_9, %c0_10] : memref<1x256xf32, #tpu.memory_space<vmem>>, vector<1x256xf32>
    %13 = vector.broadcast %11 : vector<16x1xf32> to vector<16x256xf32>
    %14 = vector.broadcast %12 : vector<1x256xf32> to vector<16x256xf32>
    %15 = arith.mulf %13, %14 : vector<16x256xf32>
    %16 = arith.addf %4, %15 : vector<16x256xf32>
    %c0_11 = arith.constant 0 : index
    %c0_12 = arith.constant 0 : index
    %c0_13 = arith.constant 0 : index
    %17 = vector.load %arg4[%c0_11, %c0_12, %c0_13] : memref<1x16x1xf32, #tpu.memory_space<vmem>>, vector<1x16x1xf32>
    %18 = vector.shape_cast %17 : vector<1x16x1xf32> to vector<16x1xf32>
    %c0_14 = arith.constant 0 : index
    %c0_15 = arith.constant 0 : index
    %19 = vector.load %arg8[%c0_14, %c0_15] : memref<1x256xf32, #tpu.memory_space<vmem>>, vector<1x256xf32>
    %20 = vector.broadcast %18 : vector<16x1xf32> to vector<16x256xf32>
    %21 = vector.broadcast %19 : vector<1x256xf32> to vector<16x256xf32>
    %22 = arith.mulf %20, %21 : vector<16x256xf32>
    %23 = arith.addf %16, %22 : vector<16x256xf32>
    %c0_16 = arith.constant 0 : index
    %c0_17 = arith.constant 0 : index
    %c0_18 = arith.constant 0 : index
    %24 = vector.load %arg5[%c0_16, %c0_17, %c0_18] : memref<1x1x256xf32, #tpu.memory_space<vmem>>, vector<1x1x256xf32>
    %25 = vector.shape_cast %24 : vector<1x1x256xf32> to vector<1x256xf32>
    %26 = vector.broadcast %25 : vector<1x256xf32> to vector<16x256xf32>
    %27 = arith.addf %23, %26 : vector<16x256xf32>
    %28 = arith.truncf %27 : vector<16x256xf32> to vector<16x256xbf16>
    %c0_19 = arith.constant 0 : index
    %c0_20 = arith.constant 0 : index
    %c0_21 = arith.constant 0 : index
    %29 = vector.load %arg9[%c0_19, %c0_20, %c0_21] : memref<1x16x256xbf16, #tpu.memory_space<vmem>>, vector<1x16x256xbf16>
    %30 = vector.shape_cast %29 : vector<1x16x256xbf16> to vector<16x256xbf16>
    %31 = vector.shape_cast %28 : vector<16x256xbf16> to vector<1x16x256xbf16>
    tpu.vector_store %arg9[%c0_19, %c0_20, %c0_21], %31 {strides = array<i32>} : memref<1x16x256xbf16, #tpu.memory_space<vmem>>, vector<1x16x256xbf16>,
    return
  }
  func.func @transform_0(%arg0: i32, %arg1: i32) -> (i32, i32, i32) {
    %c0_i32 = arith.constant 0 : i32
    %c0_i32_0 = arith.constant 0 : i32
    return %arg0, %arg1, %c0_i32 : i32, i32, i32
  }
  func.func @transform_1(%arg0: i32, %arg1: i32) -> (i32, i32, i32) {
    %c0_i32 = arith.constant 0 : i32
    %c0_i32_0 = arith.constant 0 : i32
    return %arg0, %arg1, %c0_i32 : i32, i32, i32
  }
  func.func @transform_2(%arg0: i32, %arg1: i32) -> (i32, i32, i32) {
    %c0_i32 = arith.constant 0 : i32
    %c0_i32_0 = arith.constant 0 : i32
    return %arg0, %arg1, %c0_i32 : i32, i32, i32
  }
  func.func @transform_3(%arg0: i32, %arg1: i32) -> (i32, i32, i32) {
    %c0_i32 = arith.constant 0 : i32
    %c0_i32_0 = arith.constant 0 : i32
    %c0_i32_1 = arith.constant 0 : i32
    return %arg0, %c0_i32, %c0_i32_0 : i32, i32, i32
  }
  func.func @transform_4(%arg0: i32, %arg1: i32) -> (i32, i32) {
    %c0_i32 = arith.constant 0 : i32
    %c0_i32_0 = arith.constant 0 : i32
    %c0_i32_1 = arith.constant 0 : i32
    return %c0_i32, %c0_i32_0 : i32, i32
  }
  func.func @transform_5(%arg0: i32, %arg1: i32) -> (i32, i32) {
    %c0_i32 = arith.constant 0 : i32
    %c0_i32_0 = arith.constant 0 : i32
    %c0_i32_1 = arith.constant 0 : i32
    return %c0_i32, %c0_i32_0 : i32, i32
  }
  func.func @transform_6(%arg0: i32, %arg1: i32) -> (i32, i32) {
    %c0_i32 = arith.constant 0 : i32
    %c0_i32_0 = arith.constant 0 : i32
    %c0_i32_1 = arith.constant 0 : i32
    return %c0_i32, %c0_i32_0 : i32, i32
  }
  func.func @transform_7(%arg0: i32, %arg1: i32) -> (i32, i32, i32) {
    %c0_i32 = arith.constant 0 : i32
    %c0_i32_0 = arith.constant 0 : i32
    return %arg0, %arg1, %c0_i32 : i32, i32, i32
  }
}

</mosaic_0001>

<bundles_post_ra>
// kernel: tpu_custom_call.1
= control target key start
LH: loop header
LB: loop body
LE: loop exit
PB: predicated region body
PF: predicated region fallthrough
CT: control target
= control target key end

     0   :  { %12 = vsyncpa [#allocation3], 0  ;;  %s1440_s0 = inlined_call_operand.vmem [shape: f32[2,16,256], index: 0, kind: input, shape index: {}]   ;;  %s1441_s1 = inlined_call_operand.vmem [shape: f32[2,16,1], index: 1, kind: input, shape index: {}]   ;;  %s1442_s2 = inlined_call_operand.vmem [shape: f32[2,16,1], index: 2, kind: input, shape index: {}]   ;;  %s1443_s3 = inlined_call_operand.vmem [shape: f32[2,1,256], index: 3, kind: input, shape index: {}]   ;;  %s1444_s4 = inlined_call_operand.hbm [shape: bf16[256,256], index: 4, kind: input, shape index: {}]   ;;  %s1445_s5 = inlined_call_operand.vmem [shape: f32[1,256], index: 5, kind: input, shape index: {}]   ;;  %s1446_s6 = inlined_call_operand.vmem [shape: f32[1,256], index: 6, kind: input, shape index: {}]   ;;  %s1447_s7 = inlined_call_operand.hbm [shape: bf16[2,16,256], index: 7, kind: output, shape index: {}]  }
   0x1   :  { %13 = vsyncpa [#allocation4], 0 }
   0x2   :  { %15 = vsyncpa [#allocation4 + $0x1], 0  ;;  %s1257_s24 = smov 0   ;;  %s1259_s25 = smov 0  }
   0x3   :  { %s1261_s26 = smov 0   ;;  %s1263_s27 = smov 0  }
   0x4   :  { %s1265_s28 = smov 0   ;;  %s1267_s29 = smov 0  }
   0x5 LB: > { %s913_s30 = sadd.s32 4294967295, %s1208_s29   ;;  %s914_s8 = sadd.s32 4294967294, %s1208_s29   ;;  %s1208_s29 = sphi %s1267_s29, %s21_s29   ;;  %s1204_s28 = sphi %s1265_s28, %s1465_s28   ;;  %s1200_s27 = sphi %s1263_s27, %s1464_s27   ;;  %s1196_s26 = sphi %s1261_s26, %s1463_s26   ;;  %s1192_s25 = sphi %s1259_s25, %s1462_s25   ;;  %s1188_s24 = sphi %s1257_s24, %s1461_s24  }
   0x6   : > { %s33_s9 = sadd.s32 1, %s1204_s28  ;;  %s215_s10 = sadd.s32 1, %s1196_s26 }
   0x7   : > { %p35_p0 = scmp.ge.s32.totalorder %s33_s9, 2  ;;  %p225_p1 = scmp.ne.s32.totalorder %s1196_s26, %s1192_s25 }
   0x8   : > { %p226_p2 = scmp.eq.s32.totalorder %s913_s30, 1  ;;  %p231_p3 = scmp.ne.s32.totalorder %s1192_s25, %s1188_s24 }
   0x9   : > { %s1467_s9 = smov (%p35_p0, %s33_s9), 0  ;;  %p232_p5 = scmp.eq.s32.totalorder %s914_s8, 1 }
   0xa   : > { %p1297_p4 = por %p226_p2, %p225_p1  ;;  %s210_s12 = ssub.s32 %s1204_s28, %s1467_s9 }
   0xb   : > { %p915_p6 = scmp.ge.s32.totalorder %s1208_s29, 1  ;;  %p213_p7 = scmp.eq.s32.totalorder %s210_s12, 0 }
   0xc   : > { %s1452_s11 = scalar_select %p1297_p4, 1, 0 }
   0xd   : > { %p1304_p8 = por %p232_p5, %p231_p3  ;;  %p239_p9 = scmp.lt.s32.totalorder %s1208_s29, 3 }
   0xe   : > { %s1310_s14 = scalar_select %p213_p7, %s1196_s26, %s215_s10  }
   0xf   : > { %s1453_s13 = scalar_select %p1304_p8, 1, 0 }
  0x10   : > { %p1312_p10 = pnand %p915_p6, %p239_p9  ;;  %p1316_p11 = scmp.eq.s32.totalorder %s913_s30, 0 }
  0x11   : > { %s1210_s17 = smov [#allocation2]   ;;  %s1098_s22 = scalar_lea.hbm %s1444_s4, 4096 }
  0x12   : > { %s1454_s15 = scalar_select %p1312_p10, 1, 0 }
  0x13   : > { %s1455_s16 = scalar_select %p1316_p11, 1, 0 }
  0x14   : > { %p979_p12 = pneg %p1312_p10  ;;  %s251_s18 = sshll.u32 %s1210_s17, 4  ;;  %s252_s18 = int_to_ptr.vmem [resolvable:$true] %s251_s18 }
  0x15   : > { %p1099_p0 = scmp.ne.s32.totalorder %s1444_s4, %s1098_s22  ;;  %p1105_p5 = scmp.lt.u32.totalorder %s1098_s22, %s1444_s4 }
  0x16   : > { %p1324_p13 = pnand %p1316_p11, %p979_p12 }
  0x18   : > { %p1100_p1 = pneg %p1324_p13 }
  0x1a   : > { %p1101_p2 = pnand %p1100_p1, %p1099_p0 }
  0x1c   : > { %p1102_p3 = pneg %p1101_p2 }
  0x1e   : > { %p1107_p6 = pnand %p1105_p5, %p1102_p3 }
  0x20   : > { %1110 = shalt.err (!%p1107_p6)
}
  0x21   : > { %s1111_s12 = scalar_lea.vmem %s252_s18, 4096  ;;  %p1119_p8 = scmp.lt.s32.totalorder %s252_s18, %s252_s18 }
  0x22   : > { %p1112_p7 = scmp.ne.s32.totalorder %s252_s18, %s1111_s12  ;;  %p1120_p4 = scmp.lt.s32.totalorder %s1111_s12, %s1111_s12 }
  0x24   : > { %p1114_p9 = pnand %p1112_p7, %p1100_p1  ;;  %p1121_p11 = por %p1120_p4, %p1119_p8 }
  0x26   : > { %p1115_p12 = pneg %p1114_p9 }
  0x28   : > { %p1122_p10 = pnand %p1121_p11, %p1115_p12 }
  0x2a   : > { %1125 = shalt.err (!%p1122_p10)
}
  0x2b   : > { %s1211_s17 = smov 128   ;;  %s1212_s20 = smov 8  }
  0x2c   : > { %982 = dma.hbm_to_vmem [thread:$0]  (!%p1324_p13), %s1444_s4, 4096, %s252_s18, [#allocation3], %s1211_s17, %s1211_s17, %s1212_s20  }
  0x2d   : > { %p1457_p0 = scmp.ne.s32.totalorder %s1454_s15, 0 }
  0x2e   : > { %p1458_p2 = scmp.ne.s32.totalorder (!%p1457_p0), %s1455_s16, 0 }
  0x2f   : > { %320 = sbr.rel (%p1457_p0) target bundleno = 359 (0x167), region = 48 }
  0x36   : > { %1179 = dma.done.wait (%p1458_p2), [#allocation3], 4096  }
  0x37   : > { %1181 = vsyncadd (%p1458_p2), [#allocation3], 4294963200  ;;  %v1213_v0 = vmov 0   ;;  %v1046_v1 = vld [vmem:[#allocation2 + $0x4] ss:$8 sps:$4 sm:$0xff]   ;;  %p380_p4 = scmp.lt.s32.totalorder %s1200_s27, 1  ;;  %v475_v51 = vlaneseq }
  0x38   : > { %1044 = vset.pattern.permute.xlu0 %v1213_v0  ;;  %1045 = vset.pattern.permute.xlu1 %v1213_v0  ;;  %v1048_v2 = vld [vmem:[#allocation2] ss:$8 sps:$4 sm:$0xff]   ;;  %v1049_v3 = vld [vmem:[#allocation2 + $0x14] ss:$8 sps:$4 sm:$0xff]   ;;  %v1051_v4 = vld [vmem:[#allocation2 + $0x10] ss:$8 sps:$4 sm:$0xff]  }
  0x39   : > { %649 = vmatprep.subr.bf16.mxu0 %v1046_v1  ;;  %v1052_v5 = vld [vmem:[#allocation2 + $0x24] ss:$8 sps:$4 sm:$0xff]   ;;  %v1054_v6 = vld [vmem:[#allocation2 + $0x20] ss:$8 sps:$4 sm:$0xff]   ;;  %v1055_v7 = vld [vmem:[#allocation2 + $0x34] ss:$8 sps:$4 sm:$0xff]  }
  0x3a   : > { %650 = vmatpush1.bf16.msra.mxu0 %v1048_v2  ;;  %v1057_v8 = vld [vmem:[#allocation2 + $0x30] ss:$8 sps:$4 sm:$0xff]   ;;  %s1352_s15 = scalar_select %p380_p4, %s1200_s27, 1  ;;  %v1058_v9 = vld [vmem:[#allocation2 + $0x44] ss:$8 sps:$4 sm:$0xff]   ;;  %v476_v52 = vshrl.u32 %v475_v51, 7 }
  0x3b   : > { %651 = vmatprep.subr.bf16.mxu0 %v1049_v3  ;;  %v1060_v10 = vld [vmem:[#allocation2 + $0x40] ss:$8 sps:$4 sm:$0xff]   ;;  %v1061_v11 = vld [vmem:[#allocation2 + $0x54] ss:$8 sps:$4 sm:$0xff]   ;;  %v1063_v12 = vld [vmem:[#allocation2 + $0x50] ss:$8 sps:$4 sm:$0xff]  }
  0x3c   : > { %s967_s16 = sshll.u32 %s1352_s15, 5  ;;  %s968_s18 = sshll.u32 %s1352_s15, 4  ;;  %v1064_v13 = vld [vmem:[#allocation2 + $0x64] ss:$8 sps:$4 sm:$0xff]   ;;  %v1066_v18 = vld [vmem:[#allocation2 + $0x60] ss:$8 sps:$4 sm:$0xff]  }
  0x3d   : > { %s1359_s30 = scalar_lea.vmem %s1440_s0, %s967_s16  ;;  %s398_s12 = scalar_lea.vmem %s1441_s1, %s968_s18  ;;  %v1067_v22 = vld [vmem:[#allocation2 + $0x74] ss:$8 sps:$4 sm:$0xff]   ;;  %v1069_v27 = vld [vmem:[#allocation2 + $0x70] ss:$8 sps:$4 sm:$0xff]   ;;  %v1070_v28 = vld [vmem:[#allocation2 + $0x84] ss:$8 sps:$4 sm:$0xff]  }
  0x3e   : > { %652 = vmatpush1.bf16.msra.mxu0 %v1051_v4  ;;  %s408_s21 = scalar_lea.vmem %s1442_s2, %s968_s18  ;;  %v416_v14 = vld [vmem:[%s1359_s30 + $0x8] sm:$0xff]  ;;  %v418_v15 = vld [vmem:[%s1359_s30 + $0x18] sm:$0xff]  ;;  %v453_v17 = vld [vmem:[%s398_s12] sm:$0xff]  ;;  %v477_v53 = vsub.s32 0, %v476_v52  ;;  %v481_v55 = vsub.s32 1, %v476_v52  ;;  %s927_s22 = sshll.u32 %s1352_s15, 1 }
  0x3f   : > { %653 = vmatprep.subr.bf16.mxu0 %v1052_v5  ;;  %v420_v16 = vpack.c.bf16 %v418_v15, %v416_v14  ;;  %v454_v19 = vld [vmem:[%s398_s12 + $0x8] sm:$0xff]  ;;  %v455_v20 = vmul.f32 0.0014285714, %v453_v17  ;;  %v692_v21 = vld [vmem:[%s408_s21] sm:$0xff]  ;;  %v1073_v30 = vld [vmem:[#allocation2 + $0x94] ss:$8 sps:$4 sm:$0xff]   ;;  %s413_s10 = scalar_lea.vmem %s1443_s3, %s927_s22 }
  0x40   : > { %v456_v23 = vmul.f32 0.0014285714, %v454_v19  ;;  %697 = vperm.xlu1 %1045, %v692_v21   ;;  %v693_v26 = vld [vmem:[%s408_s21 + $0x8] sm:$0xff]  ;;  %v1075_v31 = vld [vmem:[#allocation2 + $0x90] ss:$8 sps:$4 sm:$0xff]   ;;  %v415_v48 = vld [vmem:[%s1359_s30] sm:$0xff] }
  0x41   : > { %681 = vmatprep.mubr.bf16.mxu0 %v420_v16  ;;  %v457_v24 = vadd.f32 1.0, %v455_v20  ;;  %v1072_v29 = vld [vmem:[#allocation2 + $0x80] ss:$8 sps:$4 sm:$0xff]   ;;  %v1076_v32 = vld [vmem:[#allocation2 + $0xa4] ss:$8 sps:$4 sm:$0xff]   ;;  %v417_v49 = vld [vmem:[%s1359_s30 + $0x10] sm:$0xff] }
  0x42   : > { %654 = vmatpush1.bf16.msra.mxu0 %v1054_v6  ;;  %v458_v25 = vadd.f32 1.0, %v456_v23  ;;  %v1078_v36 = vld [vmem:[#allocation2 + $0xa0] ss:$8 sps:$4 sm:$0xff]   ;;  %v1079_v37 = vld [vmem:[#allocation2 + $0xb4] ss:$8 sps:$4 sm:$0xff]   ;;  %v419_v50 = vpack.c.bf16 %v417_v49, %v415_v48  ;;  %s376_s12 = sand.u32 1, %s1192_s25  }
  0x43   : > { %655 = vmatprep.subr.bf16.mxu0 %v1055_v7  ;;  %1094 = vlog2.f32 %v457_v24  ;;  %v1081_v39 = vld [vmem:[#allocation2 + $0xb0] ss:$8 sps:$4 sm:$0xff]   ;;  %v1082_v40 = vld [vmem:[#allocation2 + $0xc4] ss:$8 sps:$4 sm:$0xff]   ;;  %v1084_v41 = vld [vmem:[#allocation2 + $0xc0] ss:$8 sps:$4 sm:$0xff]  }
  0x44   : > { %1096 = vlog2.f32 %v458_v25  ;;  %702 = vperm.xlu1 %1045, %v693_v26   ;;  %v1085_v42 = vld [vmem:[#allocation2 + $0xd4] ss:$8 sps:$4 sm:$0xff]   ;;  %v1087_v43 = vld [vmem:[#allocation2 + $0xd0] ss:$8 sps:$4 sm:$0xff]   ;;  %v1088_v44 = vld [vmem:[#allocation2 + $0xe4] ss:$8 sps:$4 sm:$0xff]  }
  0x45   : > { %v1090_v45 = vld [vmem:[#allocation2 + $0xe0] ss:$8 sps:$4 sm:$0xff]   ;;  %v1091_v46 = vld [vmem:[#allocation2 + $0xf4] ss:$8 sps:$4 sm:$0xff]   ;;  %v1093_v47 = vld [vmem:[#allocation2 + $0xf0] ss:$8 sps:$4 sm:$0xff]  }
  0x46   : > { %656 = vmatpush1.bf16.msra.mxu0 %v1057_v8  ;;  %v463_v54 = vld [vmem:[%s1445_s5] sm:$0x3]  ;;  %s920_s17 = sshll.u32 %s376_s12, 4  ;;  %s972_s21 = sshll.u32 %s1200_s27, 8 }
  0x47   : > { %657 = vmatprep.subr.bf16.mxu0 %v1058_v9  ;;  %v694_v57 = vld [vmem:[%s1446_s6] sm:$0x3]  ;;  %v478_v58 = vrot.slane %v463_v54, %v477_v53  ;;  %v482_v61 = vrot.slane %v463_v54, %v481_v55  ;;  %s378_s15 = scalar_lea.vmem [#allocation5], %s920_s17  ;;  %s1388_s18 = scalar_lea.hbm %s1447_s7, %s972_s21 }
  0x48   : > { %v709_v60 = vrot.slane %v694_v57, %v477_v53  ;;  %v713_v63 = vrot.slane %v694_v57, %v481_v55  ;;  %v724_v1 = vld [vmem:[%s413_s10] sm:$0x3]  ;;  %s771_s20 = sshll.u32 %s378_s15, 4  ;;  %s1394_s19 = scalar_lea.sflag [#allocation4], %s376_s12  ;;  %s1390_s20 = int_to_ptr.vmem [resolvable:$true] %s771_s20 }
  0x49   : > { %v729_v8 = vrot.slane %v724_v1, %v477_v53  ;;  %s1126_s27 = scalar_lea.vmem %s1390_s20, 256  ;;  %p1459_p10 = scmp.ne.s32.totalorder %s1452_s11, 0 }
  0x4a   : > { %658 = vmatpush1.bf16.msra.mxu0 %v1060_v10  ;;  %p1127_p8 = scmp.ne.s32.totalorder %s1390_s20, %s1126_s27  ;;  %s1214_s22 = smov [#allocation5]  }
  0x4b   : > { %659 = vmatprep.subr.bf16.mxu0 %v1061_v11  ;;  %s1130_s30 = sshll.u32 %s1214_s22, 4  ;;  %s1131_s30 = int_to_ptr.vmem [resolvable:$false] %s1130_s30 }
  0x4c   : > { %p1128_p11 = pnand %p1127_p8, %p1459_p10  ;;  %s1132_s8 = scalar_lea.vmem %s1131_s30, 512 }
  0x4d   : > { %v1095_v33 = vpop.eup %1094  ;;  %p1133_p1 = scmp.lt.s32.totalorder %s1390_s20, %s1131_s30  ;;  %p1134_p3 = scmp.lt.s32.totalorder %s1132_s8, %s1126_s27 }
  0x4e   : > { %660 = vmatpush1.bf16.msra.mxu0 %v1063_v12  ;;  %v1097_v34 = vpop.eup %1096  ;;  %v460_v35 = vmul.f32 0.6931472, %v1095_v33  ;;  %p1129_p13 = pneg %p1128_p11 }
  0x4f   : > { %661 = vmatprep.subr.bf16.mxu0 %v1064_v13  ;;  %v462_v38 = vmul.f32 0.6931472, %v1097_v34  ;;  %v733_v13 = vrot.slane %v724_v1, %v481_v55  ;;  %p1135_p5 = por %p1134_p3, %p1133_p1 }
  0x50   : > { %466 = vperm.xlu0 %1044, %v460_v35  }
  0x51   : > { %p1136_p6 = pnand %p1135_p5, %p1129_p13 }
  0x52   : > { %662 = vmatpush1.bf16.msra.mxu0 %v1066_v18 }
  0x53   : > { %663 = vmatprep.subr.bf16.mxu0 %v1067_v22 }
  0x54   : > { %471 = vperm.xlu0 %1044, %v462_v38  }
  0x56   : > { %664 = vmatpush1.bf16.msra.mxu0 %v1069_v27 }
  0x57   : > { %665 = vmatprep.subr.bf16.mxu0 %v1070_v28 }
  0x5a   : > { %666 = vmatpush1.bf16.msra.mxu0 %v1072_v29 }
  0x5b   : > { %667 = vmatprep.subr.bf16.mxu0 %v1073_v30 }
  0x5e   : > { %668 = vmatpush1.bf16.msra.mxu0 %v1075_v31 }
  0x5f   : > { %669 = vmatprep.subr.bf16.mxu0 %v1076_v32 }
  0x62   : > { %670 = vmatpush1.bf16.msra.mxu0 %v1078_v36 }
  0x63   : > { %671 = vmatprep.subr.bf16.mxu0 %v1079_v37 }
  0x66   : > { %672 = vmatpush1.bf16.msra.mxu0 %v1081_v39 }
  0x67   : > { %673 = vmatprep.subr.bf16.mxu0 %v1082_v40 }
  0x6a   : > { %674 = vmatpush1.bf16.msra.mxu0 %v1084_v41 }
  0x6b   : > { %675 = vmatprep.subr.bf16.mxu0 %v1085_v42 }
  0x6e   : > { %676 = vmatpush1.bf16.msra.mxu0 %v1087_v43 }
  0x6f   : > { %677 = vmatprep.subr.bf16.mxu0 %v1088_v44 }
  0x72   : > { %678 = vmatpush1.bf16.msra.mxu0 %v1090_v45 }
  0x73   : > { %679 = vmatprep.subr.bf16.mxu0 %v1091_v46 }
  0x76   : > { %680 = vmatpush1.bf16.msra.mxu0 %v1093_v47 }
  0x79   : > { %682 = vmatmul.mubr.bf16.vlgmr.msra.gmra.mrb[0].mxu0 %v419_v50 }
  0xbf   : > { %v698_v59 = vpop.permute.xlu1 %697 }
  0xc0   : > { %v716_v2 = vmul.f32 %v709_v60, %v698_v59  ;;  %v717_v10 = vmul.f32 %v713_v63, %v698_v59 }
  0xc3   : > { %v703_v4 = vpop.permute.xlu1 %702 }
  0xc4   : > { %v718_v15 = vmul.f32 %v709_v60, %v703_v4  ;;  %v719_v19 = vmul.f32 %v713_v63, %v703_v4 }
  0xcf   : > { %v467_v56 = vpop.permute.xlu0 %466 }
  0xd0   : > { %v485_v62 = vmul.f32 %v478_v58, %v467_v56  ;;  %v486_v3 = vmul.f32 %v482_v61, %v467_v56 }
  0xd3   : > { %v472_v0 = vpop.permute.xlu0 %471 }
  0xd4   : > { %v487_v6 = vmul.f32 %v478_v58, %v472_v0  ;;  %v488_v11 = vmul.f32 %v482_v61, %v472_v0 }
 0x14c   : > { %v683_v5 = vpop.f32.mrb[0].mxu0 }
 0x14d   : > { %v684_v7 = vadd.f32 %v683_v5, %v485_v62  ;;  %v685_v9 = vpop.f32.mrb[1].mxu0 }
 0x14e   : > { %v686_v12 = vadd.f32 %v685_v9, %v486_v3  ;;  %v687_v14 = vpop.f32.mrb[2].mxu0 }
 0x14f   : > { %v720_v16 = vadd.f32 %v716_v2, %v684_v7  ;;  %v688_v17 = vadd.f32 %v687_v14, %v487_v6  ;;  %v689_v18 = vpop.f32.mrb[3].mxu0 }
 0x150   : > { %v721_v20 = vadd.f32 %v717_v10, %v686_v12  ;;  %v690_v21 = vadd.f32 %v689_v18, %v488_v11 }
 0x151   : > { %v736_v22 = vadd.f32 %v729_v8, %v720_v16  ;;  %v722_v23 = vadd.f32 %v718_v15, %v688_v17 }
 0x152   : > { %v737_v24 = vadd.f32 %v733_v13, %v721_v20  ;;  %v723_v25 = vadd.f32 %v719_v19, %v690_v21 }
 0x153   : > { %v738_v26 = vadd.f32 %v729_v8, %v722_v23 }
 0x154   : > { %v970_v27 = vpack.c.bf16 %v737_v24, %v736_v22  ;;  %v739_v28 = vadd.f32 %v733_v13, %v723_v25 }
 0x156   : > { %752 = vst [vmem:[%s378_s15] sm:$0xff] %v970_v27  ;;  %v971_v29 = vpack.c.bf16 %v739_v28, %v738_v26 }
 0x158   : > { %753 = vst [vmem:[%s378_s15 + $0x8] sm:$0xff] %v971_v29 }
 0x159   : > { %1139 = shalt.err (!%p1136_p6)
}
 0x15a   : > { %s1140_s10 = scalar_lea.hbm %s1388_s18, 256  ;;  %s1144_s15 = scalar_lea.hbm %s1447_s7, 512 }
 0x15b   : > { %p1141_p7 = scmp.ne.s32.totalorder %s1388_s18, %s1140_s10  ;;  %p1145_p0 = scmp.lt.u32.totalorder %s1388_s18, %s1447_s7 }
 0x15c   : > { %p1146_p2 = scmp.lt.u32.totalorder %s1144_s15, %s1140_s10  ;;  %p1148_p8 = scmp.lt.u32.totalorder %s1140_s10, %s1388_s18 }
 0x15d   : > { %p1142_p9 = pnand %p1141_p7, %p1459_p10 }
 0x15e   : > { %p1147_p4 = por %p1146_p2, %p1145_p0 }
 0x15f   : > { %p1143_p12 = pneg %p1142_p9 }
 0x160   : > { %p1149_p11 = por %p1148_p8, %p1147_p4 }
 0x162   : > { %p1150_p13 = pnand %p1149_p11, %p1143_p12 }
 0x164   : > { %1153 = shalt.err (!%p1150_p13)
}
 0x165   : > { %s1215_s16 = smov 128   ;;  %s1216_s27 = smov 8  }
 0x166   : > { %977 = dma.vmem_to_hbm [thread:$0]  (%p1459_p10), %s1390_s20, 256, %s1388_s18, %s1394_s19, %s1215_s16, %s1215_s16, %s1216_s27  }
 0x167 PF: > { %p989_p1 = scmp.ge.s32.totalorder %s1208_s29, 2  ;;  %s786_s22 = sand.u32 1, %s1188_s24  }
 0x168   : > { %p1460_p3 = scmp.ne.s32.totalorder %s1453_s13, 0  ;;  %s787_s30 = scalar_lea.sflag [#allocation4], %s786_s22 }
 0x16a   : > { %p984_p5 = pnand %p989_p1, %p1460_p3 }
 0x16c   : > { %1183 = dma.done.wait (!%p984_p5), %s787_s30, 256  }
 0x16d   : > { %1185 = vsyncadd (!%p984_p5), %s787_s30, 4294967040  ;;  %s21_s29 = sadd.s32 1, %s1208_s29   ;;  %s1461_s24 = smov %s1192_s25 }
 0x16e   : > { %p18_p6 = scmp.ge.s32.totalorder %s21_s29, 4   ;;  %s1462_s25 = smov %s1196_s26 }
 0x16f   : > { %s1463_s26 = smov %s1310_s14  ;;  %s1464_s27 = smov %s1204_s28 }
 0x170   : > { %s1465_s28 = smov %s1467_s9  ;;  %20 = sbr.rel (!%p18_p6) target bundleno = 5 (0x5), region = 97 }
 0x177   :  { %792 = vsyncpa [#allocation3], 1 }
 0x178   :  { %794 = vsyncpa [#allocation3 + $0x1], 1 }
 0x179   :  { %795 = vsyncpa [#allocation4], 1 }
 0x17a   :  { %797 = vsyncpa [#allocation4 + $0x1], 1 }

</bundles_post_ra>
